<compile_context>
chip_gen: v7x
topology: tpu7x:2x2x1
jax: 0.10.0
libtpu: 0.0.40
codegen_flags: <defaults>
</compile_context>

<pallas_src>
import functools

import jax
import jax.numpy as jnp
from jax.experimental import pallas as pl
from jax.experimental.pallas import tpu as pltpu

PAD = 128          # lane width: pad every feature dim to this
NEG_BIAS = -1e30   # bias for padded output columns -> exp() underflows to exactly 0


def _round_up(n, m):
    return (n + m - 1) // m * m


def make_mlp_softmax_kernel(num_layers):
    """Fused L-layer MLP: (L-1) x [matmul+bias+relu] -> matmul+bias -> softmax(-1)."""

    def kernel(x_ref, w_ref, b_ref, out_ref):
        h = x_ref[...]                                                   # (TB, PAD)
        # hidden layers (static Python unroll; num_layers is small)
        for l in range(num_layers - 1):
            h = jnp.dot(h, w_ref[l], preferred_element_type=jnp.float32) + b_ref[l]
            h = jnp.maximum(h, 0.0)
        # output layer + numerically-stable softmax over the lane axis
        logits = (jnp.dot(h, w_ref[num_layers - 1],
                          preferred_element_type=jnp.float32)
                  + b_ref[num_layers - 1])
        m = jnp.max(logits, axis=-1, keepdims=True)
        e = jnp.exp(logits - m)                                          # pad cols -> 0
        denom = jnp.sum(e, axis=-1, keepdims=True)
        out_ref[...] = e * pl.reciprocal(denom, approx=False)            # EUP, not VPU div

    return kernel


def pack_params(params, pad=PAD):
    """Stack per-layer (W, b) into (L, pad, pad) / (L, 1, pad) f32 buffers.

    Weight rows/cols beyond the logical dims are zero; hidden-layer pad biases are
    zero (relu(0)=0, contributes nothing); final-layer pad biases are NEG_BIAS so the
    softmax gives those columns probability 0.
    """
    num_layers = len(params)
    w_stack = jnp.zeros((num_layers, pad, pad), jnp.float32)
    b_stack = jnp.zeros((num_layers, 1, pad), jnp.float32)
    for l, (w, b) in enumerate(params):
        in_d, out_d = w.shape
        w_stack = w_stack.at[l, :in_d, :out_d].set(w.astype(jnp.float32))
        b_stack = b_stack.at[l, :, :out_d].set(b.reshape(1, -1).astype(jnp.float32))
    last_out = params[-1][0].shape[1]
    if last_out < pad:
        b_stack = b_stack.at[num_layers - 1, :, last_out:].set(NEG_BIAS)
    return w_stack, b_stack


@functools.partial(jax.jit, static_argnames=("in_dim", "out_dim", "tb_max"))
def full_connection_forward(x, w_stack, b_stack, *, in_dim, out_dim, tb_max=256):
    """Batch-tiled fused forward. x: (batch, in_dim) f32. Returns (batch, out_dim)."""
    num_layers, pad, _ = w_stack.shape
    batch = x.shape[0]

    # round batch to a multiple of 8 sublanes, then pick a batch tile (multiple of 8)
    batch_p = _round_up(batch, 8)
    tb = min(tb_max, batch_p)
    batch_p = _round_up(batch_p, tb)

    # zero-pad rows (extra states) and columns (feature dim -> 128 lanes)
    x_p = jnp.zeros((batch_p, pad), jnp.float32).at[:batch, :in_dim].set(x)

    grid = (batch_p // tb,)
    out_p = pl.pallas_call(
        make_mlp_softmax_kernel(num_layers),
        out_shape=jax.ShapeDtypeStruct((batch_p, pad), jnp.float32),
        grid_spec=pltpu.PrefetchScalarGridSpec(
            num_scalar_prefetch=0,
            grid=grid,
            in_specs=[
                # x streams one (tb, pad) tile per grid step (double-buffered by Pallas)
                pl.BlockSpec((tb, pad), lambda i: (i, 0)),
                # weights / biases: full-array blocks, same block every step -> resident in VMEM
                pl.BlockSpec((num_layers, pad, pad), lambda i: (0, 0, 0)),
                pl.BlockSpec((num_layers, 1, pad), lambda i: (0, 0, 0)),
            ],
            out_specs=pl.BlockSpec((tb, pad), lambda i: (i, 0)),
        ),
        compiler_params=pltpu.CompilerParams(
            # independent batch tiles -> megacore sharding on v7x
            dimension_semantics=("parallel",),
            # generous headroom; per-step footprint is ~2*(2*tb*pad*4) + L*pad*pad*4 bytes,
            # well inside v7x's 32 MiB default scoped VMEM even at tb=256.
            vmem_limit_bytes=32 * 1024 * 1024,
        ),
    )(x_p, w_stack, b_stack)

    return out_p[:batch, :out_dim]


def init_params(key, layer_sizes):
    """torch.nn.Linear-style init: uniform +/- 1/sqrt(fan_in); W stored as (in, out)."""
    params = []
    for in_dim, out_dim in zip(layer_sizes[:-1], layer_sizes[1:]):
        key, kw, kb = jax.random.split(key, 3)
        bound = 1.0 / jnp.sqrt(float(in_dim))
        w = jax.random.uniform(kw, (in_dim, out_dim), jnp.float32, -bound, bound)
        b = jax.random.uniform(kb, (1, out_dim), jnp.float32, -bound, bound)
        params.append((w, b))
    return params


def reference_forward(x, params):
    """Pure-JAX reference of FullConnectionNetwork.forward."""
    h = x
    for w, b in params[:-1]:
        h = jax.nn.relu(h @ w + b)
    w, b = params[-1]
    return jax.nn.softmax(h @ w + b, axis=-1)


if __name__ == "__main__":
    # FullConnectionNetwork(input_size=16, output_size=8, hidden_layers=[32, 32])
    input_size, output_size = 16, 8
    hidden = [32, 32]
    layer_sizes = [input_size] + hidden + [output_size]

    key = jax.random.PRNGKey(0)
    key, kx = jax.random.split(key)
    params = init_params(key, layer_sizes)
    w_stack, b_stack = pack_params(params)

    # small batch (pads 4 -> 8 rows, single grid step)
    batch = 4
    x = jax.random.normal(kx, (batch, input_size), jnp.float32)
    out = full_connection_forward(x, w_stack, b_stack,
                                  in_dim=input_size, out_dim=output_size)
    out = jax.block_until_ready(out)
    ref = reference_forward(x, params)
    assert out.shape == (batch, output_size)
    assert jnp.allclose(jnp.sum(out, axis=-1), 1.0, atol=1e-5)
    assert jnp.allclose(out, ref, atol=1e-5, rtol=1e-5)

    # ragged larger batch to exercise the batch-tiled grid + padding path
    key, kx2 = jax.random.split(key)
    batch2 = 300
    x2 = jax.random.normal(kx2, (batch2, input_size), jnp.float32)
    out2 = full_connection_forward(x2, w_stack, b_stack,
                                   in_dim=input_size, out_dim=output_size)
    out2 = jax.block_until_ready(out2)
    ref2 = reference_forward(x2, params)
    assert out2.shape == (batch2, output_size)
    assert jnp.allclose(out2, ref2, atol=1e-5, rtol=1e-5)

    # TODO(synk): make_decision's torch.multinomial sampling / argmax is host-side
    # policy logic, not part of the forward kernel.
    print("KERNEL_OK")
</pallas_src>

<mosaic_0001>
module attributes {stable_mosaic.version = 11 : i64} {
  func.func @kernel(%arg0: i32, %arg1: memref<8x128xf32, #tpu.memory_space<vmem>>, %arg2: memref<3x128x128xf32, #tpu.memory_space<vmem>>, %arg3: memref<3x1x128xf32, #tpu.memory_space<vmem>>, %arg4: memref<8x128xf32, #tpu.memory_space<vmem>>) attributes {dimension_semantics = [#tpu.dimension_semantics<parallel>], iteration_bounds = array<i64: 1>, scalar_prefetch = 0 : i64, scratch_operands = 0 : i64, tpu.core_type = #tpu.core_type<tc>, window_params = [{transform_indices = @transform_0, window_bounds = array<i64: 8, 128>}, {pipeline_mode = #tpu.pipeline_mode<synchronous>, transform_indices = @transform_1, window_bounds = array<i64: 3, 128, 128>}, {pipeline_mode = #tpu.pipeline_mode<synchronous>, transform_indices = @transform_2, window_bounds = array<i64: 3, 1, 128>}, {transform_indices = @transform_3, window_bounds = array<i64: 8, 128>}]} {
    %c0 = arith.constant 0 : index
    %c0_0 = arith.constant 0 : index
    %0 = vector.load %arg1[%c0, %c0_0] : memref<8x128xf32, #tpu.memory_space<vmem>>, vector<8x128xf32>
    %c0_1 = arith.constant 0 : index
    %c0_2 = arith.constant 0 : index
    %c0_3 = arith.constant 0 : index
    %1 = vector.load %arg2[%c0_1, %c0_2, %c0_3] : memref<3x128x128xf32, #tpu.memory_space<vmem>>, vector<1x128x128xf32>
    %2 = vector.shape_cast %1 : vector<1x128x128xf32> to vector<128x128xf32>
    %cst = arith.constant dense<0.000000e+00> : vector<8x128xf32>
    %3 = tpu.matmul %0, %2, %cst {dimension_numbers = #tpu.dot_dimension_numbers<[1], [0], [0], [1], [0, 0, 1, 1], [], []>} : vector<8x128xf32>, vector<128x128xf32>, vector<8x128xf32> -> vector<8x128xf32>
    %c0_4 = arith.constant 0 : index
    %c0_5 = arith.constant 0 : index
    %c0_6 = arith.constant 0 : index
    %4 = vector.load %arg3[%c0_4, %c0_5, %c0_6] : memref<3x1x128xf32, #tpu.memory_space<vmem>>, vector<1x1x128xf32>
    %5 = vector.shape_cast %4 : vector<1x1x128xf32> to vector<1x128xf32>
    %6 = vector.broadcast %5 : vector<1x128xf32> to vector<8x128xf32>
    %7 = arith.addf %3, %6 : vector<8x128xf32>
    %cst_7 = arith.constant 0.000000e+00 : f32
    %8 = vector.broadcast %cst_7 : f32 to vector<8x128xf32>
    %9 = arith.maximumf %7, %8 : vector<8x128xf32>
    %c1 = arith.constant 1 : index
    %c0_8 = arith.constant 0 : index
    %c0_9 = arith.constant 0 : index
    %10 = vector.load %arg2[%c1, %c0_8, %c0_9] : memref<3x128x128xf32, #tpu.memory_space<vmem>>, vector<1x128x128xf32>
    %11 = vector.shape_cast %10 : vector<1x128x128xf32> to vector<128x128xf32>
    %cst_10 = arith.constant dense<0.000000e+00> : vector<8x128xf32>
    %12 = tpu.matmul %9, %11, %cst_10 {dimension_numbers = #tpu.dot_dimension_numbers<[1], [0], [0], [1], [0, 0, 1, 1], [], []>} : vector<8x128xf32>, vector<128x128xf32>, vector<8x128xf32> -> vector<8x128xf32>
    %c1_11 = arith.constant 1 : index
    %c0_12 = arith.constant 0 : index
    %c0_13 = arith.constant 0 : index
    %13 = vector.load %arg3[%c1_11, %c0_12, %c0_13] : memref<3x1x128xf32, #tpu.memory_space<vmem>>, vector<1x1x128xf32>
    %14 = vector.shape_cast %13 : vector<1x1x128xf32> to vector<1x128xf32>
    %15 = vector.broadcast %14 : vector<1x128xf32> to vector<8x128xf32>
    %16 = arith.addf %12, %15 : vector<8x128xf32>
    %cst_14 = arith.constant 0.000000e+00 : f32
    %17 = vector.broadcast %cst_14 : f32 to vector<8x128xf32>
    %18 = arith.maximumf %16, %17 : vector<8x128xf32>
    %c2 = arith.constant 2 : index
    %c0_15 = arith.constant 0 : index
    %c0_16 = arith.constant 0 : index
    %19 = vector.load %arg2[%c2, %c0_15, %c0_16] : memref<3x128x128xf32, #tpu.memory_space<vmem>>, vector<1x128x128xf32>
    %20 = vector.shape_cast %19 : vector<1x128x128xf32> to vector<128x128xf32>
    %cst_17 = arith.constant dense<0.000000e+00> : vector<8x128xf32>
    %21 = tpu.matmul %18, %20, %cst_17 {dimension_numbers = #tpu.dot_dimension_numbers<[1], [0], [0], [1], [0, 0, 1, 1], [], []>} : vector<8x128xf32>, vector<128x128xf32>, vector<8x128xf32> -> vector<8x128xf32>
    %c2_18 = arith.constant 2 : index
    %c0_19 = arith.constant 0 : index
    %c0_20 = arith.constant 0 : index
    %22 = vector.load %arg3[%c2_18, %c0_19, %c0_20] : memref<3x1x128xf32, #tpu.memory_space<vmem>>, vector<1x1x128xf32>
    %23 = vector.shape_cast %22 : vector<1x1x128xf32> to vector<1x128xf32>
    %24 = vector.broadcast %23 : vector<1x128xf32> to vector<8x128xf32>
    %25 = arith.addf %21, %24 : vector<8x128xf32>
    %cst_21 = arith.constant dense<0xFF800000> : vector<8xf32>
    %26 = vector.multi_reduction <maximumf>, %25, %cst_21 [1] : vector<8x128xf32> to vector<8xf32>
    %27 = vector.shape_cast %26 : vector<8xf32> to vector<8x1xf32>
    %28 = vector.broadcast %27 : vector<8x1xf32> to vector<8x128xf32>
    %29 = arith.subf %25, %28 : vector<8x128xf32>
    %30 = math.exp %29 : vector<8x128xf32>
    %cst_22 = arith.constant dense<0.000000e+00> : vector<8xf32>
    %31 = vector.multi_reduction <add>, %30, %cst_22 [1] : vector<8x128xf32> to vector<8xf32>
    %32 = vector.shape_cast %31 : vector<8xf32> to vector<8x1xf32>
    %33 = tpu.reciprocal %32 : vector<8x1xf32> -> vector<8x1xf32>
    %34 = vector.broadcast %33 : vector<8x1xf32> to vector<8x128xf32>
    %35 = arith.mulf %30, %34 : vector<8x128xf32>
    %c0_23 = arith.constant 0 : index
    %c0_24 = arith.constant 0 : index
    %36 = vector.load %arg4[%c0_23, %c0_24] : memref<8x128xf32, #tpu.memory_space<vmem>>, vector<8x128xf32>
    tpu.vector_store %arg4[%c0_23, %c0_24], %35 {strides = array<i32>} : memref<8x128xf32, #tpu.memory_space<vmem>>, vector<8x128xf32>,
    return
  }
  func.func @transform_0(%arg0: i32) -> (i32, i32) {
    %c0_i32 = arith.constant 0 : i32
    %c0_i32_0 = arith.constant 0 : i32
    return %arg0, %c0_i32 : i32, i32
  }
  func.func @transform_1(%arg0: i32) -> (i32, i32, i32) {
    %c0_i32 = arith.constant 0 : i32
    %c0_i32_0 = arith.constant 0 : i32
    %c0_i32_1 = arith.constant 0 : i32
    %c0_i32_2 = arith.constant 0 : i32
    return %c0_i32, %c0_i32_0, %c0_i32_1 : i32, i32, i32
  }
  func.func @transform_2(%arg0: i32) -> (i32, i32, i32) {
    %c0_i32 = arith.constant 0 : i32
    %c0_i32_0 = arith.constant 0 : i32
    %c0_i32_1 = arith.constant 0 : i32
    %c0_i32_2 = arith.constant 0 : i32
    return %c0_i32, %c0_i32_0, %c0_i32_1 : i32, i32, i32
  }
  func.func @transform_3(%arg0: i32) -> (i32, i32) {
    %c0_i32 = arith.constant 0 : i32
    %c0_i32_0 = arith.constant 0 : i32
    return %arg0, %c0_i32 : i32, i32
  }
}

</mosaic_0001>

<bundles_post_ra>
// kernel: full_connection_forward.1
= control target key start
LH: loop header
LB: loop body
LE: loop exit
PB: predicated region body
PF: predicated region fallthrough
CT: control target
= control target key end

     0   :  { %8 = vsyncpa [#allocation3], 0  ;;  %s596_s12 = smov [#allocation2]   ;;  %s679_s0 = inlined_call_operand.vmem [shape: f32[8,128], index: 0, kind: input, shape index: {}]   ;;  %s680_s1 = inlined_call_operand.hbm [shape: f32[3,128,128], index: 1, kind: input, shape index: {}]   ;;  %s681_s2 = inlined_call_operand.vmem [shape: f32[3,1,128], index: 2, kind: input, shape index: {}]   ;;  %s682_s3 = inlined_call_operand.vmem [shape: f32[8,128], index: 3, kind: output, shape index: {}]  }
   0x1   :  { %s16_s13 = sshll.u32 %s596_s12, 4  ;;  %s572_s16 = scalar_lea.hbm %s680_s1, 6144  ;;  %s17_s13 = int_to_ptr.vmem [resolvable:$true] %s16_s13 }
   0x2   :  { %p573_p0 = scmp.ne.s32.totalorder %s680_s1, %s572_s16  ;;  %p576_p1 = scmp.lt.u32.totalorder %s572_s16, %s680_s1 }
   0x4   :  { %p578_p2 = pnand %p576_p1, %p573_p0 }
   0x6   :  { %581 = shalt.err (!%p578_p2)
}
   0x7   :  { %s582_s21 = scalar_lea.vmem %s17_s13, 6144  ;;  %p587_p4 = scmp.lt.s32.totalorder %s17_s13, %s17_s13 }
   0x8   :  { %p583_p3 = scmp.ne.s32.totalorder %s17_s13, %s582_s21  ;;  %p588_p5 = scmp.lt.s32.totalorder %s582_s21, %s582_s21 }
   0xa   :  { %p589_p6 = por %p588_p5, %p587_p4 }
   0xc   :  { %p590_p7 = pnand %p589_p6, %p583_p3 }
   0xe   :  { %593 = shalt.err (!%p590_p7)
}
   0xf   :  { %s597_s22 = smov 128   ;;  %s598_s23 = smov 8  }
  0x10   :  { %22 = dma.hbm_to_vmem [thread:$0]  %s680_s1, 6144, %s17_s13, [#allocation3], %s597_s22, %s597_s22, %s598_s23  }
  0x11   :  { %594 = dma.done.wait [#allocation3], 6144  }
  0x12   :  { %595 = vsyncadd [#allocation3], 4294961152  ;;  %v599_v0 = vmov 0.0|0.0   ;;  %vm600_vm0 = vmmov 0   ;;  %v601_v1 = vmov 0.0   ;;  %v29_v2 = vld [vmem:[#allocation2] sm:$0xff] }
  0x13   :  { %490 = vmatprep.subr.bf16.mxu0 %v599_v0  ;;  %417 = vmatprep.mubr.msk.f32.mxu0 %vm600_vm0, %v601_v1  ;;  %v30_v3 = vld [vmem:[#allocation2 + $0x8] sm:$0xff]  ;;  %v31_v4 = vld [vmem:[#allocation2 + $0x10] sm:$0xff]  ;;  %v32_v6 = vld [vmem:[#allocation2 + $0x18] sm:$0xff] }
  0x14   :  { %514 = vmatprep.subr.bf16.mxu1 %v599_v0  ;;  %452 = vmatprep.mubr.msk.f32.mxu1 %vm600_vm0, %v601_v1  ;;  %v491_v5 = vpack.c.bf16 %v30_v3, %v29_v2  ;;  %v494_v7 = vpack.c.bf16 %v32_v6, %v31_v4  ;;  %v33_v8 = vld [vmem:[#allocation2 + $0x20] sm:$0xff]  ;;  %v34_v9 = vld [vmem:[#allocation2 + $0x28] sm:$0xff]  ;;  %v126_v12 = vld [vmem:[#allocation2 + $0x90] sm:$0xff] }
  0x15   :  { %v124_v10 = vld [vmem:[#allocation2 + $0x80] sm:$0xff]  ;;  %v125_v11 = vld [vmem:[#allocation2 + $0x88] sm:$0xff]  ;;  %v127_v13 = vld [vmem:[#allocation2 + $0x98] sm:$0xff]  ;;  %v497_v14 = vpack.c.bf16 %v34_v9, %v33_v8 }
  0x16   :  { %492 = vmatpush3.bf16.msra.mxu0 %v491_v5  ;;  %v515_v15 = vpack.c.bf16 %v125_v11, %v124_v10  ;;  %v35_v16 = vld [vmem:[#allocation2 + $0x30] sm:$0xff]  ;;  %v36_v17 = vld [vmem:[#allocation2 + $0x38] sm:$0xff]  ;;  %v518_v18 = vpack.c.bf16 %v127_v13, %v126_v12  ;;  %v128_v19 = vld [vmem:[#allocation2 + $0xa0] sm:$0xff] }
  0x17   :  { %493 = vmatprep.subr.bf16.mxu0 %v599_v0  ;;  %v129_v20 = vld [vmem:[#allocation2 + $0xa8] sm:$0xff]  ;;  %v500_v21 = vpack.c.bf16 %v36_v17, %v35_v16  ;;  %v37_v22 = vld [vmem:[#allocation2 + $0x40] sm:$0xff]  ;;  %v130_v25 = vld [vmem:[#allocation2 + $0xb0] sm:$0xff] }
  0x18   :  { %516 = vmatpush3.bf16.msra.mxu1 %v515_v15  ;;  %v38_v23 = vld [vmem:[#allocation2 + $0x48] sm:$0xff]  ;;  %v521_v24 = vpack.c.bf16 %v129_v20, %v128_v19  ;;  %v131_v26 = vld [vmem:[#allocation2 + $0xb8] sm:$0xff]  ;;  %v39_v28 = vld [vmem:[#allocation2 + $0x50] sm:$0xff] }
  0x19   :  { %517 = vmatprep.subr.bf16.mxu1 %v599_v0  ;;  %v503_v27 = vpack.c.bf16 %v38_v23, %v37_v22  ;;  %v40_v29 = vld [vmem:[#allocation2 + $0x58] sm:$0xff]  ;;  %v524_v30 = vpack.c.bf16 %v131_v26, %v130_v25  ;;  %v132_v31 = vld [vmem:[#allocation2 + $0xc0] sm:$0xff]  ;;  %v133_v32 = vld [vmem:[#allocation2 + $0xc8] sm:$0xff] }
  0x1a   :  { %495 = vmatpush3.bf16.msra.mxu0 %v494_v7  ;;  %v506_v33 = vpack.c.bf16 %v40_v29, %v39_v28  ;;  %v41_v34 = vld [vmem:[#allocation2 + $0x60] sm:$0xff]  ;;  %v42_v35 = vld [vmem:[#allocation2 + $0x68] sm:$0xff]  ;;  %v527_v36 = vpack.c.bf16 %v133_v32, %v132_v31  ;;  %v134_v37 = vld [vmem:[#allocation2 + $0xd0] sm:$0xff] }
  0x1b   :  { %496 = vmatprep.subr.bf16.mxu0 %v599_v0  ;;  %v135_v38 = vld [vmem:[#allocation2 + $0xd8] sm:$0xff]  ;;  %v509_v39 = vpack.c.bf16 %v42_v35, %v41_v34  ;;  %v43_v40 = vld [vmem:[#allocation2 + $0x70] sm:$0xff]  ;;  %v136_v43 = vld [vmem:[#allocation2 + $0xe0] sm:$0xff] }
  0x1c   :  { %519 = vmatpush3.bf16.msra.mxu1 %v518_v18  ;;  %v44_v41 = vld [vmem:[#allocation2 + $0x78] sm:$0xff]  ;;  %v530_v42 = vpack.c.bf16 %v135_v38, %v134_v37  ;;  %v137_v44 = vld [vmem:[#allocation2 + $0xe8] sm:$0xff]  ;;  %v28_v47 = vld [vmem:[%s679_s0] sm:$0xff] }
  0x1d   :  { %520 = vmatprep.subr.bf16.mxu1 %v599_v0  ;;  %v512_v45 = vpack.c.bf16 %v44_v41, %v43_v40  ;;  %v533_v46 = vpack.c.bf16 %v137_v44, %v136_v43  ;;  %v138_v48 = vld [vmem:[#allocation2 + $0xf0] sm:$0xff]  ;;  %v139_v49 = vld [vmem:[#allocation2 + $0xf8] sm:$0xff]  ;;  %v220_v51 = vld [vmem:[#allocation2 + $0x100] sm:$0xff] }
  0x1e   :  { %498 = vmatpush3.bf16.msra.mxu0 %v497_v14  ;;  %v536_v50 = vpack.c.bf16 %v139_v49, %v138_v48  ;;  %v221_v52 = vld [vmem:[#allocation2 + $0x108] sm:$0xff]  ;;  %v222_v53 = vld [vmem:[#allocation2 + $0x110] sm:$0xff]  ;;  %v223_v55 = vld [vmem:[#allocation2 + $0x118] sm:$0xff] }
  0x1f   :  { %499 = vmatprep.subr.bf16.mxu0 %v599_v0  ;;  %v539_v54 = vpack.c.bf16 %v221_v52, %v220_v51  ;;  %v542_v56 = vpack.c.bf16 %v223_v55, %v222_v53  ;;  %v224_v57 = vld [vmem:[#allocation2 + $0x120] sm:$0xff]  ;;  %v225_v58 = vld [vmem:[#allocation2 + $0x128] sm:$0xff]  ;;  %v226_v60 = vld [vmem:[#allocation2 + $0x130] sm:$0xff] }
  0x20   :  { %522 = vmatpush3.bf16.msra.mxu1 %v521_v24  ;;  %v545_v59 = vpack.c.bf16 %v225_v58, %v224_v57  ;;  %v227_v61 = vld [vmem:[#allocation2 + $0x138] sm:$0xff]  ;;  %v228_v63 = vld [vmem:[#allocation2 + $0x140] sm:$0xff]  ;;  %v230_v3 = vld [vmem:[#allocation2 + $0x150] sm:$0xff] }
  0x21   :  { %523 = vmatprep.subr.bf16.mxu1 %v599_v0  ;;  %v548_v62 = vpack.c.bf16 %v227_v61, %v226_v60  ;;  %v231_v4 = vld [vmem:[#allocation2 + $0x158] sm:$0xff]  ;;  %v232_v6 = vld [vmem:[#allocation2 + $0x160] sm:$0xff]  ;;  %v233_v7 = vld [vmem:[#allocation2 + $0x168] sm:$0xff] }
  0x22   :  { %501 = vmatpush3.bf16.msra.mxu0 %v500_v21  ;;  %v554_v5 = vpack.c.bf16 %v231_v4, %v230_v3  ;;  %v557_v8 = vpack.c.bf16 %v233_v7, %v232_v6  ;;  %v329_v9 = vld [vmem:[%s681_s2] ss:$0 sm:$0xff]  ;;  %v234_v14 = vld [vmem:[#allocation2 + $0x170] sm:$0xff]  ;;  %v235_v15 = vld [vmem:[#allocation2 + $0x178] sm:$0xff] }
  0x23   :  { %502 = vmatprep.subr.bf16.mxu0 %v599_v0  ;;  %v560_v16 = vpack.c.bf16 %v235_v15, %v234_v14  ;;  %v331_v17 = vld [vmem:[%s681_s2 + $0x1] ss:$0 sm:$0xff]  ;;  %v333_v21 = vld [vmem:[%s681_s2 + $0x2] ss:$0 sm:$0xff] }
  0x24   :  { %525 = vmatpush3.bf16.msra.mxu1 %v524_v30 }
  0x25   :  { %526 = vmatprep.subr.bf16.mxu1 %v599_v0 }
  0x26   :  { %504 = vmatpush3.bf16.msra.mxu0 %v503_v27 }
  0x27   :  { %505 = vmatprep.subr.bf16.mxu0 %v599_v0 }
  0x28   :  { %528 = vmatpush3.bf16.msra.mxu1 %v527_v36 }
  0x29   :  { %529 = vmatprep.subr.bf16.mxu1 %v599_v0 }
  0x2a   :  { %507 = vmatpush3.bf16.msra.mxu0 %v506_v33 }
  0x2b   :  { %508 = vmatprep.subr.bf16.mxu0 %v599_v0 }
  0x2c   :  { %531 = vmatpush3.bf16.msra.mxu1 %v530_v42 }
  0x2d   :  { %532 = vmatprep.subr.bf16.mxu1 %v599_v0 }
  0x2e   :  { %510 = vmatpush3.bf16.msra.mxu0 %v509_v39 }
  0x2f   :  { %511 = vmatprep.subr.bf16.mxu0 %v599_v0 }
  0x30   :  { %534 = vmatpush3.bf16.msra.mxu1 %v533_v46 }
  0x31   :  { %535 = vmatprep.subr.bf16.mxu1 %v599_v0 }
  0x32   :  { %513 = vmatpush3.bf16.msra.mxu0 %v512_v45 }
  0x33   :  { %538 = vmatprep.subr.bf16.mxu0 %v599_v0 }
  0x34   :  { %537 = vmatpush3.bf16.msra.mxu1 %v536_v50 }
  0x35   :  { %418 = vmatmul.mubr.f32.vlgmr.msra.gmra.mrb[0].mxu0 %v28_v47 }
  0x36   :  { %487 = vmatprep.mubr.msk.f32.mxu0 %vm600_vm0, %v601_v1  ;;  %540 = vmatpush3.bf16.msra.mxu0 %v539_v54  ;;  %v229_v1 = vld [vmem:[#allocation2 + $0x148] sm:$0xff] }
  0x37   :  { %541 = vmatprep.subr.bf16.mxu0 %v599_v0  ;;  %v551_v2 = vpack.c.bf16 %v229_v1, %v228_v63 }
  0x3a   :  { %543 = vmatpush3.bf16.msra.mxu0 %v542_v56 }
  0x3b   :  { %544 = vmatprep.subr.bf16.mxu0 %v599_v0 }
  0x3e   :  { %546 = vmatpush3.bf16.msra.mxu0 %v545_v59 }
  0x3f   :  { %547 = vmatprep.subr.bf16.mxu0 %v599_v0 }
  0x42   :  { %549 = vmatpush3.bf16.msra.mxu0 %v548_v62 }
  0x43   :  { %550 = vmatprep.subr.bf16.mxu0 %v599_v0 }
  0x46   :  { %552 = vmatpush3.bf16.msra.mxu0 %v551_v2 }
  0x47   :  { %553 = vmatprep.subr.bf16.mxu0 %v599_v0 }
  0x4a   :  { %555 = vmatpush3.bf16.msra.mxu0 %v554_v5 }
  0x4b   :  { %556 = vmatprep.subr.bf16.mxu0 %v599_v0 }
  0x4e   :  { %558 = vmatpush3.bf16.msra.mxu0 %v557_v8 }
  0x4f   :  { %559 = vmatprep.subr.bf16.mxu0 %v599_v0 }
  0x52   :  { %561 = vmatpush3.bf16.msra.mxu0 %v560_v16 }
 0x108   :  { %v118_v10 = vpop.f32.mrb[0].mxu0 }
 0x109   :  { %v119_v11 = vadd.f32 %v329_v9, %v118_v10  ;;  %v419_v12 = vpop.f32.mrb[1].mxu0 }
 0x10b   :  { %v122_v13 = vmax.f32 %v119_v11, 0.0 }
 0x10d   :  { %453 = vmatmul.mubr.f32.vlgmr.msra.gmra.mrb[0].mxu1 %v122_v13 }
 0x1e0   :  { %v214_v18 = vpop.f32.mrb[0].mxu1 }
 0x1e1   :  { %v215_v19 = vadd.f32 %v331_v17, %v214_v18  ;;  %v454_v0 = vpop.f32.mrb[1].mxu1 }
 0x1e3   :  { %v218_v20 = vmax.f32 %v215_v19, 0.0 }
 0x1e5   :  { %488 = vmatmul.mubr.f32.vlgmr.msra.gmra.mrb[2].mxu0 %v218_v20 }
 0x2b8   :  { %v310_v22 = vpop.f32.mrb[2].mxu0 }
 0x2b9   :  { %v311_v23 = vadd.f32 %v333_v21, %v310_v22  ;;  %v489_v24 = vpop.f32.mrb[3].mxu0 }
 0x2bb   :  { %314 = vmax.xlane.f32.xlu0 %v311_v23 }
 0x348   :  { %v315_v25 = vpop.xlane.xlu0 %314 }
 0x349   :  { %v316_v26 = vsub.f32 %v311_v23, %v315_v25 }
 0x34b   :  { %v317_v27 = vmul.f32 1.442695, %v316_v26 }
 0x34d   :  { %568 = vpow2.f32 %v317_v27 }
 0x357   :  { %v569_v28 = vpop.eup %568 }
 0x358   :  { %319 = vadd.xlane.f32.xlu0 %v569_v28 }
 0x3e5   :  { %v320_v29 = vpop.xlane.xlu0 %319 }
 0x3e6   :  { %570 = vrcp.f32 %v320_v29 }
 0x3f0   :  { %v571_v30 = vpop.eup %570 }
 0x3f1   :  { %v322_v31 = vmul.f32 %v571_v30, %v569_v28 }
 0x3f3   :  { %323 = vst [vmem:[%s682_s3] sm:$0xff] %v322_v31 }
 0x3f4   :  { %328 = vsyncpa [#allocation3], 1 }

</bundles_post_ra>
